<compile_context>
chip_gen: v7x
topology: tpu7x:2x2x1
jax: 0.10.0
libtpu: 0.0.40
codegen_flags: <defaults>
</compile_context>

<pallas_src>
import jax
import jax.numpy as jnp
from jax import lax
from jax.experimental import pallas as pl
from jax.experimental.pallas import tpu as pltpu

HEADS = 2
EMB = 4
HEAD_DIM = EMB // HEADS


def _self_attention_kernel(q_ref, k_ref, v_ref, wt_ref, b_ref, o_ref):
    """Single grid step -- everything lives in VMEM.

    q/k/v_ref : (N, H, L, hd)  head-major layout (reshaped in wrapper)
    wt_ref    : (H, hd, E)     fc_out weight, pre-transposed to (in, out), split by head
    b_ref     : (1, E)         fc_out bias
    o_ref     : (N, L, E)      output
    """
    n_batch = q_ref.shape[0]
    scale = 1.0 / (EMB ** 0.5)
    bias = b_ref[...]  # (1, E), broadcasts over L

    for n in range(n_batch):           # static unroll (N is tiny)
        acc = None
        for h in range(HEADS):         # static unroll over heads
            qh = q_ref[n, h]           # (L, hd) -- leading-dim index, no lane slicing
            kh = k_ref[n, h]
            vh = v_ref[n, h]

            # energy[q,k] = sum_d qh[q,d] * kh[k,d]  (contract last dims; no transpose)
            energy = lax.dot_general(
                qh, kh, (((1,), (1,)), ((), ())),
                preferred_element_type=jnp.float32) * scale          # (L, L)

            # numerically stable softmax over the key axis
            m = jnp.max(energy, axis=-1, keepdims=True)
            p = jnp.exp(energy - m)
            s = jnp.sum(p, axis=-1, keepdims=True)
            inv = pl.reciprocal(s, approx=True)       # EUP slot (otherwise idle)
            inv = inv * (2.0 - s * inv)               # one Newton step -> f32-accurate
            attn = p * inv

            head_out = jnp.dot(attn, vh, preferred_element_type=jnp.float32)   # (L, hd)

            # fc_out folded per head: y = sum_h head_out_h @ W^T[h*hd:(h+1)*hd, :]
            # (avoids concatenating 2-lane head slices back into (L, E))
            y = jnp.dot(head_out, wt_ref[h], preferred_element_type=jnp.float32)  # (L, E)
            acc = y if acc is None else acc + y

        o_ref[n] = (acc + bias).astype(o_ref.dtype)


@jax.jit
def self_attention_einsum(values, keys, query, fc_w, fc_b):
    """values/keys/query: (N, L, E) float32; fc_w: (E, E) (out, in); fc_b: (E,)."""
    N, L, E = query.shape
    assert E == EMB

    # Wrapper-side (free XLA) layout massaging:
    def to_heads(x):
        return x.reshape(N, L, HEADS, HEAD_DIM).transpose(0, 2, 1, 3)  # (N, H, L, hd)

    q4 = to_heads(query)
    k4 = to_heads(keys)
    v4 = to_heads(values)
    wt = fc_w.T.reshape(HEADS, HEAD_DIM, EMB)  # (H, hd, E): (in, out) layout, per head
    b2 = fc_b.reshape(1, EMB)

    return pl.pallas_call(
        _self_attention_kernel,
        out_shape=jax.ShapeDtypeStruct((N, L, E), jnp.float32),
        grid_spec=pltpu.PrefetchScalarGridSpec(
            num_scalar_prefetch=0,
            grid=(1,),  # single step: one DMA per operand, no per-batch pipeline cost
            in_specs=[
                pl.BlockSpec((N, HEADS, L, HEAD_DIM), lambda i: (0, 0, 0, 0)),  # q
                pl.BlockSpec((N, HEADS, L, HEAD_DIM), lambda i: (0, 0, 0, 0)),  # k
                pl.BlockSpec((N, HEADS, L, HEAD_DIM), lambda i: (0, 0, 0, 0)),  # v
                pl.BlockSpec((HEADS, HEAD_DIM, EMB), lambda i: (0, 0, 0)),      # fc_out W^T
                pl.BlockSpec((1, EMB), lambda i: (0, 0)),                       # fc_out bias
            ],
            out_specs=pl.BlockSpec((N, L, EMB), lambda i: (0, 0, 0)),
        ),
        compiler_params=pltpu.CompilerParams(
            dimension_semantics=("arbitrary",),
        ),
    )(q4, k4, v4, wt, b2)


def _reference(values, keys, query, fc_w, fc_b):
    """Pure-JAX reference mirroring the PyTorch forward (mask=None)."""
    N, L, E = query.shape
    q = query.reshape(N, L, HEADS, HEAD_DIM)
    k = keys.reshape(N, L, HEADS, HEAD_DIM)
    v = values.reshape(N, L, HEADS, HEAD_DIM)
    energy = jnp.einsum("nqhd,nkhd->nhqk", q, k)
    attn = jax.nn.softmax(energy / (E ** 0.5), axis=3)
    out = jnp.einsum("nhql,nlhd->nqhd", attn, v).reshape(N, L, HEADS * HEAD_DIM)
    return out @ fc_w.T + fc_b


if __name__ == "__main__":
    key = jax.random.PRNGKey(0)
    k_embed, k_w, k_b, k_wu = jax.random.split(key, 4)

    # Deterministic "embedding": table of shape (10, emb_dim); clamp the tutorial's
    # token ids into range (ids like 674 overflow a 10-row table).
    embed_table = jax.random.normal(k_embed, (10, EMB), dtype=jnp.float32)
    input_seq = jnp.array(
        [[1, 28, 674, 672, 400, 400, 400, 1],
         [1, 28, 28, 2, 4, 5, 7, 800],
         [1, 27, 673, 671, 402, 399, 401, 2]],
        dtype=jnp.int32,
    ) % 10
    queries = embed_table[input_seq]          # (3, 8, 4)
    keys_in = queries
    values_in = queries

    # fc_out parameters (PyTorch Linear: weight (out,in), bias (out,)).
    fc_w = (jax.random.uniform(k_w, (EMB, EMB), dtype=jnp.float32) - 0.5) * 2.0 / (EMB ** 0.5)
    fc_b = (jax.random.uniform(k_b, (EMB,), dtype=jnp.float32) - 0.5) * 2.0 / (EMB ** 0.5)

    # Unused-in-forward per-head projections (initialized for shape fidelity only).
    _unused_qkv_proj = jax.random.normal(k_wu, (3, HEAD_DIM, HEAD_DIM), dtype=jnp.float32)

    out = self_attention_einsum(values_in, keys_in, queries, fc_w, fc_b)
    out = jax.block_until_ready(out)

    ref = _reference(values_in, keys_in, queries, fc_w, fc_b)
    assert out.shape == (3, 8, EMB)
    assert jnp.allclose(out, ref, atol=1e-5, rtol=1e-5), "mismatch vs. reference"

    print("KERNEL_OK")
</pallas_src>

<mosaic_0001>
module attributes {stable_mosaic.version = 11 : i64} {
  func.func @_self_attention_kernel(%arg0: i32, %arg1: memref<3x2x8x2xf32, #tpu.memory_space<vmem>>, %arg2: memref<3x2x8x2xf32, #tpu.memory_space<vmem>>, %arg3: memref<3x2x8x2xf32, #tpu.memory_space<vmem>>, %arg4: memref<2x2x4xf32, #tpu.memory_space<vmem>>, %arg5: memref<1x4xf32, #tpu.memory_space<vmem>>, %arg6: memref<3x8x4xf32, #tpu.memory_space<vmem>>) attributes {dimension_semantics = [#tpu.dimension_semantics<arbitrary>], iteration_bounds = array<i64: 1>, scalar_prefetch = 0 : i64, scratch_operands = 0 : i64, tpu.core_type = #tpu.core_type<tc>, window_params = [{pipeline_mode = #tpu.pipeline_mode<synchronous>, transform_indices = @transform_0, window_bounds = array<i64: 3, 2, 8, 2>}, {pipeline_mode = #tpu.pipeline_mode<synchronous>, transform_indices = @transform_1, window_bounds = array<i64: 3, 2, 8, 2>}, {pipeline_mode = #tpu.pipeline_mode<synchronous>, transform_indices = @transform_2, window_bounds = array<i64: 3, 2, 8, 2>}, {pipeline_mode = #tpu.pipeline_mode<synchronous>, transform_indices = @transform_3, window_bounds = array<i64: 2, 2, 4>}, {pipeline_mode = #tpu.pipeline_mode<synchronous>, transform_indices = @transform_4, window_bounds = array<i64: 1, 4>}, {pipeline_mode = #tpu.pipeline_mode<synchronous>, transform_indices = @transform_5, window_bounds = array<i64: 3, 8, 4>}]} {
    %c0 = arith.constant 0 : index
    %c0_0 = arith.constant 0 : index
    %0 = vector.load %arg5[%c0, %c0_0] : memref<1x4xf32, #tpu.memory_space<vmem>>, vector<1x4xf32>
    %c0_1 = arith.constant 0 : index
    %c0_2 = arith.constant 0 : index
    %c0_3 = arith.constant 0 : index
    %c0_4 = arith.constant 0 : index
    %1 = vector.load %arg1[%c0_1, %c0_2, %c0_3, %c0_4] : memref<3x2x8x2xf32, #tpu.memory_space<vmem>>, vector<1x1x8x2xf32>
    %2 = vector.shape_cast %1 : vector<1x1x8x2xf32> to vector<8x2xf32>
    %c0_5 = arith.constant 0 : index
    %c0_6 = arith.constant 0 : index
    %c0_7 = arith.constant 0 : index
    %c0_8 = arith.constant 0 : index
    %3 = vector.load %arg2[%c0_5, %c0_6, %c0_7, %c0_8] : memref<3x2x8x2xf32, #tpu.memory_space<vmem>>, vector<1x1x8x2xf32>
    %4 = vector.shape_cast %3 : vector<1x1x8x2xf32> to vector<8x2xf32>
    %c0_9 = arith.constant 0 : index
    %c0_10 = arith.constant 0 : index
    %c0_11 = arith.constant 0 : index
    %c0_12 = arith.constant 0 : index
    %5 = vector.load %arg3[%c0_9, %c0_10, %c0_11, %c0_12] : memref<3x2x8x2xf32, #tpu.memory_space<vmem>>, vector<1x1x8x2xf32>
    %6 = vector.shape_cast %5 : vector<1x1x8x2xf32> to vector<8x2xf32>
    %cst = arith.constant dense<0.000000e+00> : vector<8x8xf32>
    %7 = tpu.matmul %2, %4, %cst {dimension_numbers = #tpu.dot_dimension_numbers<[1], [1], [0], [0], [0, 0, 1, 0], [], []>} : vector<8x2xf32>, vector<8x2xf32>, vector<8x8xf32> -> vector<8x8xf32>
    %cst_13 = arith.constant 5.000000e-01 : f32
    %8 = vector.broadcast %cst_13 : f32 to vector<8x8xf32>
    %9 = arith.mulf %7, %8 : vector<8x8xf32>
    %cst_14 = arith.constant dense<0xFF800000> : vector<8xf32>
    %10 = vector.multi_reduction <maximumf>, %9, %cst_14 [1] : vector<8x8xf32> to vector<8xf32>
    %11 = vector.shape_cast %10 : vector<8xf32> to vector<8x1xf32>
    %12 = vector.broadcast %11 : vector<8x1xf32> to vector<8x8xf32>
    %13 = arith.subf %9, %12 : vector<8x8xf32>
    %14 = math.exp %13 : vector<8x8xf32>
    %cst_15 = arith.constant dense<0.000000e+00> : vector<8xf32>
    %15 = vector.multi_reduction <add>, %14, %cst_15 [1] : vector<8x8xf32> to vector<8xf32>
    %16 = vector.shape_cast %15 : vector<8xf32> to vector<8x1xf32>
    %17 = tpu.reciprocal %16 {approx = true} : vector<8x1xf32> -> vector<8x1xf32>
    %18 = arith.mulf %16, %17 : vector<8x1xf32>
    %cst_16 = arith.constant 2.000000e+00 : f32
    %19 = vector.broadcast %cst_16 : f32 to vector<8x1xf32>
    %20 = arith.subf %19, %18 : vector<8x1xf32>
    %21 = arith.mulf %17, %20 : vector<8x1xf32>
    %22 = vector.broadcast %21 : vector<8x1xf32> to vector<8x8xf32>
    %23 = arith.mulf %14, %22 : vector<8x8xf32>
    %cst_17 = arith.constant dense<0.000000e+00> : vector<8x2xf32>
    %24 = tpu.matmul %23, %6, %cst_17 {dimension_numbers = #tpu.dot_dimension_numbers<[1], [0], [0], [1], [0, 0, 1, 1], [], []>} : vector<8x8xf32>, vector<8x2xf32>, vector<8x2xf32> -> vector<8x2xf32>
    %c0_18 = arith.constant 0 : index
    %c0_19 = arith.constant 0 : index
    %c0_20 = arith.constant 0 : index
    %25 = vector.load %arg4[%c0_18, %c0_19, %c0_20] : memref<2x2x4xf32, #tpu.memory_space<vmem>>, vector<1x2x4xf32>
    %26 = vector.shape_cast %25 : vector<1x2x4xf32> to vector<2x4xf32>
    %cst_21 = arith.constant dense<0.000000e+00> : vector<8x4xf32>
    %27 = tpu.matmul %24, %26, %cst_21 {dimension_numbers = #tpu.dot_dimension_numbers<[1], [0], [0], [1], [0, 0, 1, 1], [], []>} : vector<8x2xf32>, vector<2x4xf32>, vector<8x4xf32> -> vector<8x4xf32>
    %c0_22 = arith.constant 0 : index
    %c1 = arith.constant 1 : index
    %c0_23 = arith.constant 0 : index
    %c0_24 = arith.constant 0 : index
    %28 = vector.load %arg1[%c0_22, %c1, %c0_23, %c0_24] : memref<3x2x8x2xf32, #tpu.memory_space<vmem>>, vector<1x1x8x2xf32>
    %29 = vector.shape_cast %28 : vector<1x1x8x2xf32> to vector<8x2xf32>
    %c0_25 = arith.constant 0 : index
    %c1_26 = arith.constant 1 : index
    %c0_27 = arith.constant 0 : index
    %c0_28 = arith.constant 0 : index
    %30 = vector.load %arg2[%c0_25, %c1_26, %c0_27, %c0_28] : memref<3x2x8x2xf32, #tpu.memory_space<vmem>>, vector<1x1x8x2xf32>
    %31 = vector.shape_cast %30 : vector<1x1x8x2xf32> to vector<8x2xf32>
    %c0_29 = arith.constant 0 : index
    %c1_30 = arith.constant 1 : index
    %c0_31 = arith.constant 0 : index
    %c0_32 = arith.constant 0 : index
    %32 = vector.load %arg3[%c0_29, %c1_30, %c0_31, %c0_32] : memref<3x2x8x2xf32, #tpu.memory_space<vmem>>, vector<1x1x8x2xf32>
    %33 = vector.shape_cast %32 : vector<1x1x8x2xf32> to vector<8x2xf32>
    %cst_33 = arith.constant dense<0.000000e+00> : vector<8x8xf32>
    %34 = tpu.matmul %29, %31, %cst_33 {dimension_numbers = #tpu.dot_dimension_numbers<[1], [1], [0], [0], [0, 0, 1, 0], [], []>} : vector<8x2xf32>, vector<8x2xf32>, vector<8x8xf32> -> vector<8x8xf32>
    %cst_34 = arith.constant 5.000000e-01 : f32
    %35 = vector.broadcast %cst_34 : f32 to vector<8x8xf32>
    %36 = arith.mulf %34, %35 : vector<8x8xf32>
    %cst_35 = arith.constant dense<0xFF800000> : vector<8xf32>
    %37 = vector.multi_reduction <maximumf>, %36, %cst_35 [1] : vector<8x8xf32> to vector<8xf32>
    %38 = vector.shape_cast %37 : vector<8xf32> to vector<8x1xf32>
    %39 = vector.broadcast %38 : vector<8x1xf32> to vector<8x8xf32>
    %40 = arith.subf %36, %39 : vector<8x8xf32>
    %41 = math.exp %40 : vector<8x8xf32>
    %cst_36 = arith.constant dense<0.000000e+00> : vector<8xf32>
    %42 = vector.multi_reduction <add>, %41, %cst_36 [1] : vector<8x8xf32> to vector<8xf32>
    %43 = vector.shape_cast %42 : vector<8xf32> to vector<8x1xf32>
    %44 = tpu.reciprocal %43 {approx = true} : vector<8x1xf32> -> vector<8x1xf32>
    %45 = arith.mulf %43, %44 : vector<8x1xf32>
    %cst_37 = arith.constant 2.000000e+00 : f32
    %46 = vector.broadcast %cst_37 : f32 to vector<8x1xf32>
    %47 = arith.subf %46, %45 : vector<8x1xf32>
    %48 = arith.mulf %44, %47 : vector<8x1xf32>
    %49 = vector.broadcast %48 : vector<8x1xf32> to vector<8x8xf32>
    %50 = arith.mulf %41, %49 : vector<8x8xf32>
    %cst_38 = arith.constant dense<0.000000e+00> : vector<8x2xf32>
    %51 = tpu.matmul %50, %33, %cst_38 {dimension_numbers = #tpu.dot_dimension_numbers<[1], [0], [0], [1], [0, 0, 1, 1], [], []>} : vector<8x8xf32>, vector<8x2xf32>, vector<8x2xf32> -> vector<8x2xf32>
    %c1_39 = arith.constant 1 : index
    %c0_40 = arith.constant 0 : index
    %c0_41 = arith.constant 0 : index
    %52 = vector.load %arg4[%c1_39, %c0_40, %c0_41] : memref<2x2x4xf32, #tpu.memory_space<vmem>>, vector<1x2x4xf32>
    %53 = vector.shape_cast %52 : vector<1x2x4xf32> to vector<2x4xf32>
    %cst_42 = arith.constant dense<0.000000e+00> : vector<8x4xf32>
    %54 = tpu.matmul %51, %53, %cst_42 {dimension_numbers = #tpu.dot_dimension_numbers<[1], [0], [0], [1], [0, 0, 1, 1], [], []>} : vector<8x2xf32>, vector<2x4xf32>, vector<8x4xf32> -> vector<8x4xf32>
    %55 = arith.addf %27, %54 : vector<8x4xf32>
    %56 = vector.broadcast %0 : vector<1x4xf32> to vector<8x4xf32>
    %57 = arith.addf %55, %56 : vector<8x4xf32>
    %c0_43 = arith.constant 0 : index
    %c0_44 = arith.constant 0 : index
    %c0_45 = arith.constant 0 : index
    %58 = vector.load %arg6[%c0_43, %c0_44, %c0_45] : memref<3x8x4xf32, #tpu.memory_space<vmem>>, vector<1x8x4xf32>
    %59 = vector.shape_cast %58 : vector<1x8x4xf32> to vector<8x4xf32>
    %60 = vector.shape_cast %57 : vector<8x4xf32> to vector<1x8x4xf32>
    tpu.vector_store %arg6[%c0_43, %c0_44, %c0_45], %60 {strides = array<i32>} : memref<3x8x4xf32, #tpu.memory_space<vmem>>, vector<1x8x4xf32>,
    %c1_46 = arith.constant 1 : index
    %c0_47 = arith.constant 0 : index
    %c0_48 = arith.constant 0 : index
    %c0_49 = arith.constant 0 : index
    %61 = vector.load %arg1[%c1_46, %c0_47, %c0_48, %c0_49] : memref<3x2x8x2xf32, #tpu.memory_space<vmem>>, vector<1x1x8x2xf32>
    %62 = vector.shape_cast %61 : vector<1x1x8x2xf32> to vector<8x2xf32>
    %c1_50 = arith.constant 1 : index
    %c0_51 = arith.constant 0 : index
    %c0_52 = arith.constant 0 : index
    %c0_53 = arith.constant 0 : index
    %63 = vector.load %arg2[%c1_50, %c0_51, %c0_52, %c0_53] : memref<3x2x8x2xf32, #tpu.memory_space<vmem>>, vector<1x1x8x2xf32>
    %64 = vector.shape_cast %63 : vector<1x1x8x2xf32> to vector<8x2xf32>
    %c1_54 = arith.constant 1 : index
    %c0_55 = arith.constant 0 : index
    %c0_56 = arith.constant 0 : index
    %c0_57 = arith.constant 0 : index
    %65 = vector.load %arg3[%c1_54, %c0_55, %c0_56, %c0_57] : memref<3x2x8x2xf32, #tpu.memory_space<vmem>>, vector<1x1x8x2xf32>
    %66 = vector.shape_cast %65 : vector<1x1x8x2xf32> to vector<8x2xf32>
    %cst_58 = arith.constant dense<0.000000e+00> : vector<8x8xf32>
    %67 = tpu.matmul %62, %64, %cst_58 {dimension_numbers = #tpu.dot_dimension_numbers<[1], [1], [0], [0], [0, 0, 1, 0], [], []>} : vector<8x2xf32>, vector<8x2xf32>, vector<8x8xf32> -> vector<8x8xf32>
    %cst_59 = arith.constant 5.000000e-01 : f32
    %68 = vector.broadcast %cst_59 : f32 to vector<8x8xf32>
    %69 = arith.mulf %67, %68 : vector<8x8xf32>
    %cst_60 = arith.constant dense<0xFF800000> : vector<8xf32>
    %70 = vector.multi_reduction <maximumf>, %69, %cst_60 [1] : vector<8x8xf32> to vector<8xf32>
    %71 = vector.shape_cast %70 : vector<8xf32> to vector<8x1xf32>
    %72 = vector.broadcast %71 : vector<8x1xf32> to vector<8x8xf32>
    %73 = arith.subf %69, %72 : vector<8x8xf32>
    %74 = math.exp %73 : vector<8x8xf32>
    %cst_61 = arith.constant dense<0.000000e+00> : vector<8xf32>
    %75 = vector.multi_reduction <add>, %74, %cst_61 [1] : vector<8x8xf32> to vector<8xf32>
    %76 = vector.shape_cast %75 : vector<8xf32> to vector<8x1xf32>
    %77 = tpu.reciprocal %76 {approx = true} : vector<8x1xf32> -> vector<8x1xf32>
    %78 = arith.mulf %76, %77 : vector<8x1xf32>
    %cst_62 = arith.constant 2.000000e+00 : f32
    %79 = vector.broadcast %cst_62 : f32 to vector<8x1xf32>
    %80 = arith.subf %79, %78 : vector<8x1xf32>
    %81 = arith.mulf %77, %80 : vector<8x1xf32>
    %82 = vector.broadcast %81 : vector<8x1xf32> to vector<8x8xf32>
    %83 = arith.mulf %74, %82 : vector<8x8xf32>
    %cst_63 = arith.constant dense<0.000000e+00> : vector<8x2xf32>
    %84 = tpu.matmul %83, %66, %cst_63 {dimension_numbers = #tpu.dot_dimension_numbers<[1], [0], [0], [1], [0, 0, 1, 1], [], []>} : vector<8x8xf32>, vector<8x2xf32>, vector<8x2xf32> -> vector<8x2xf32>
    %c0_64 = arith.constant 0 : index
    %c0_65 = arith.constant 0 : index
    %c0_66 = arith.constant 0 : index
    %85 = vector.load %arg4[%c0_64, %c0_65, %c0_66] : memref<2x2x4xf32, #tpu.memory_space<vmem>>, vector<1x2x4xf32>
    %86 = vector.shape_cast %85 : vector<1x2x4xf32> to vector<2x4xf32>
    %cst_67 = arith.constant dense<0.000000e+00> : vector<8x4xf32>
    %87 = tpu.matmul %84, %86, %cst_67 {dimension_numbers = #tpu.dot_dimension_numbers<[1], [0], [0], [1], [0, 0, 1, 1], [], []>} : vector<8x2xf32>, vector<2x4xf32>, vector<8x4xf32> -> vector<8x4xf32>
    %c1_68 = arith.constant 1 : index
    %c1_69 = arith.constant 1 : index
    %c0_70 = arith.constant 0 : index
    %c0_71 = arith.constant 0 : index
    %88 = vector.load %arg1[%c1_68, %c1_69, %c0_70, %c0_71] : memref<3x2x8x2xf32, #tpu.memory_space<vmem>>, vector<1x1x8x2xf32>
    %89 = vector.shape_cast %88 : vector<1x1x8x2xf32> to vector<8x2xf32>
    %c1_72 = arith.constant 1 : index
    %c1_73 = arith.constant 1 : index
    %c0_74 = arith.constant 0 : index
    %c0_75 = arith.constant 0 : index
    %90 = vector.load %arg2[%c1_72, %c1_73, %c0_74, %c0_75] : memref<3x2x8x2xf32, #tpu.memory_space<vmem>>, vector<1x1x8x2xf32>
    %91 = vector.shape_cast %90 : vector<1x1x8x2xf32> to vector<8x2xf32>
    %c1_76 = arith.constant 1 : index
    %c1_77 = arith.constant 1 : index
    %c0_78 = arith.constant 0 : index
    %c0_79 = arith.constant 0 : index
    %92 = vector.load %arg3[%c1_76, %c1_77, %c0_78, %c0_79] : memref<3x2x8x2xf32, #tpu.memory_space<vmem>>, vector<1x1x8x2xf32>
    %93 = vector.shape_cast %92 : vector<1x1x8x2xf32> to vector<8x2xf32>
    %cst_80 = arith.constant dense<0.000000e+00> : vector<8x8xf32>
    %94 = tpu.matmul %89, %91, %cst_80 {dimension_numbers = #tpu.dot_dimension_numbers<[1], [1], [0], [0], [0, 0, 1, 0], [], []>} : vector<8x2xf32>, vector<8x2xf32>, vector<8x8xf32> -> vector<8x8xf32>
    %cst_81 = arith.constant 5.000000e-01 : f32
    %95 = vector.broadcast %cst_81 : f32 to vector<8x8xf32>
    %96 = arith.mulf %94, %95 : vector<8x8xf32>
    %cst_82 = arith.constant dense<0xFF800000> : vector<8xf32>
    %97 = vector.multi_reduction <maximumf>, %96, %cst_82 [1] : vector<8x8xf32> to vector<8xf32>
    %98 = vector.shape_cast %97 : vector<8xf32> to vector<8x1xf32>
    %99 = vector.broadcast %98 : vector<8x1xf32> to vector<8x8xf32>
    %100 = arith.subf %96, %99 : vector<8x8xf32>
    %101 = math.exp %100 : vector<8x8xf32>
    %cst_83 = arith.constant dense<0.000000e+00> : vector<8xf32>
    %102 = vector.multi_reduction <add>, %101, %cst_83 [1] : vector<8x8xf32> to vector<8xf32>
    %103 = vector.shape_cast %102 : vector<8xf32> to vector<8x1xf32>
    %104 = tpu.reciprocal %103 {approx = true} : vector<8x1xf32> -> vector<8x1xf32>
    %105 = arith.mulf %103, %104 : vector<8x1xf32>
    %cst_84 = arith.constant 2.000000e+00 : f32
    %106 = vector.broadcast %cst_84 : f32 to vector<8x1xf32>
    %107 = arith.subf %106, %105 : vector<8x1xf32>
    %108 = arith.mulf %104, %107 : vector<8x1xf32>
    %109 = vector.broadcast %108 : vector<8x1xf32> to vector<8x8xf32>
    %110 = arith.mulf %101, %109 : vector<8x8xf32>
    %cst_85 = arith.constant dense<0.000000e+00> : vector<8x2xf32>
    %111 = tpu.matmul %110, %93, %cst_85 {dimension_numbers = #tpu.dot_dimension_numbers<[1], [0], [0], [1], [0, 0, 1, 1], [], []>} : vector<8x8xf32>, vector<8x2xf32>, vector<8x2xf32> -> vector<8x2xf32>
    %c1_86 = arith.constant 1 : index
    %c0_87 = arith.constant 0 : index
    %c0_88 = arith.constant 0 : index
    %112 = vector.load %arg4[%c1_86, %c0_87, %c0_88] : memref<2x2x4xf32, #tpu.memory_space<vmem>>, vector<1x2x4xf32>
    %113 = vector.shape_cast %112 : vector<1x2x4xf32> to vector<2x4xf32>
    %cst_89 = arith.constant dense<0.000000e+00> : vector<8x4xf32>
    %114 = tpu.matmul %111, %113, %cst_89 {dimension_numbers = #tpu.dot_dimension_numbers<[1], [0], [0], [1], [0, 0, 1, 1], [], []>} : vector<8x2xf32>, vector<2x4xf32>, vector<8x4xf32> -> vector<8x4xf32>
    %115 = arith.addf %87, %114 : vector<8x4xf32>
    %116 = vector.broadcast %0 : vector<1x4xf32> to vector<8x4xf32>
    %117 = arith.addf %115, %116 : vector<8x4xf32>
    %c1_90 = arith.constant 1 : index
    %c0_91 = arith.constant 0 : index
    %c0_92 = arith.constant 0 : index
    %118 = vector.load %arg6[%c1_90, %c0_91, %c0_92] : memref<3x8x4xf32, #tpu.memory_space<vmem>>, vector<1x8x4xf32>
    %119 = vector.shape_cast %118 : vector<1x8x4xf32> to vector<8x4xf32>
    %120 = vector.shape_cast %117 : vector<8x4xf32> to vector<1x8x4xf32>
    tpu.vector_store %arg6[%c1_90, %c0_91, %c0_92], %120 {strides = array<i32>} : memref<3x8x4xf32, #tpu.memory_space<vmem>>, vector<1x8x4xf32>,
    %c2 = arith.constant 2 : index
    %c0_93 = arith.constant 0 : index
    %c0_94 = arith.constant 0 : index
    %c0_95 = arith.constant 0 : index
    %121 = vector.load %arg1[%c2, %c0_93, %c0_94, %c0_95] : memref<3x2x8x2xf32, #tpu.memory_space<vmem>>, vector<1x1x8x2xf32>
    %122 = vector.shape_cast %121 : vector<1x1x8x2xf32> to vector<8x2xf32>
    %c2_96 = arith.constant 2 : index
    %c0_97 = arith.constant 0 : index
    %c0_98 = arith.constant 0 : index
    %c0_99 = arith.constant 0 : index
    %123 = vector.load %arg2[%c2_96, %c0_97, %c0_98, %c0_99] : memref<3x2x8x2xf32, #tpu.memory_space<vmem>>, vector<1x1x8x2xf32>
    %124 = vector.shape_cast %123 : vector<1x1x8x2xf32> to vector<8x2xf32>
    %c2_100 = arith.constant 2 : index
    %c0_101 = arith.constant 0 : index
    %c0_102 = arith.constant 0 : index
    %c0_103 = arith.constant 0 : index
    %125 = vector.load %arg3[%c2_100, %c0_101, %c0_102, %c0_103] : memref<3x2x8x2xf32, #tpu.memory_space<vmem>>, vector<1x1x8x2xf32>
    %126 = vector.shape_cast %125 : vector<1x1x8x2xf32> to vector<8x2xf32>
    %cst_104 = arith.constant dense<0.000000e+00> : vector<8x8xf32>
    %127 = tpu.matmul %122, %124, %cst_104 {dimension_numbers = #tpu.dot_dimension_numbers<[1], [1], [0], [0], [0, 0, 1, 0], [], []>} : vector<8x2xf32>, vector<8x2xf32>, vector<8x8xf32> -> vector<8x8xf32>
    %cst_105 = arith.constant 5.000000e-01 : f32
    %128 = vector.broadcast %cst_105 : f32 to vector<8x8xf32>
    %129 = arith.mulf %127, %128 : vector<8x8xf32>
    %cst_106 = arith.constant dense<0xFF800000> : vector<8xf32>
    %130 = vector.multi_reduction <maximumf>, %129, %cst_106 [1] : vector<8x8xf32> to vector<8xf32>
    %131 = vector.shape_cast %130 : vector<8xf32> to vector<8x1xf32>
    %132 = vector.broadcast %131 : vector<8x1xf32> to vector<8x8xf32>
    %133 = arith.subf %129, %132 : vector<8x8xf32>
    %134 = math.exp %133 : vector<8x8xf32>
    %cst_107 = arith.constant dense<0.000000e+00> : vector<8xf32>
    %135 = vector.multi_reduction <add>, %134, %cst_107 [1] : vector<8x8xf32> to vector<8xf32>
    %136 = vector.shape_cast %135 : vector<8xf32> to vector<8x1xf32>
    %137 = tpu.reciprocal %136 {approx = true} : vector<8x1xf32> -> vector<8x1xf32>
    %138 = arith.mulf %136, %137 : vector<8x1xf32>
    %cst_108 = arith.constant 2.000000e+00 : f32
    %139 = vector.broadcast %cst_108 : f32 to vector<8x1xf32>
    %140 = arith.subf %139, %138 : vector<8x1xf32>
    %141 = arith.mulf %137, %140 : vector<8x1xf32>
    %142 = vector.broadcast %141 : vector<8x1xf32> to vector<8x8xf32>
    %143 = arith.mulf %134, %142 : vector<8x8xf32>
    %cst_109 = arith.constant dense<0.000000e+00> : vector<8x2xf32>
    %144 = tpu.matmul %143, %126, %cst_109 {dimension_numbers = #tpu.dot_dimension_numbers<[1], [0], [0], [1], [0, 0, 1, 1], [], []>} : vector<8x8xf32>, vector<8x2xf32>, vector<8x2xf32> -> vector<8x2xf32>
    %c0_110 = arith.constant 0 : index
    %c0_111 = arith.constant 0 : index
    %c0_112 = arith.constant 0 : index
    %145 = vector.load %arg4[%c0_110, %c0_111, %c0_112] : memref<2x2x4xf32, #tpu.memory_space<vmem>>, vector<1x2x4xf32>
    %146 = vector.shape_cast %145 : vector<1x2x4xf32> to vector<2x4xf32>
    %cst_113 = arith.constant dense<0.000000e+00> : vector<8x4xf32>
    %147 = tpu.matmul %144, %146, %cst_113 {dimension_numbers = #tpu.dot_dimension_numbers<[1], [0], [0], [1], [0, 0, 1, 1], [], []>} : vector<8x2xf32>, vector<2x4xf32>, vector<8x4xf32> -> vector<8x4xf32>
    %c2_114 = arith.constant 2 : index
    %c1_115 = arith.constant 1 : index
    %c0_116 = arith.constant 0 : index
    %c0_117 = arith.constant 0 : index
    %148 = vector.load %arg1[%c2_114, %c1_115, %c0_116, %c0_117] : memref<3x2x8x2xf32, #tpu.memory_space<vmem>>, vector<1x1x8x2xf32>
    %149 = vector.shape_cast %148 : vector<1x1x8x2xf32> to vector<8x2xf32>
    %c2_118 = arith.constant 2 : index
    %c1_119 = arith.constant 1 : index
    %c0_120 = arith.constant 0 : index
    %c0_121 = arith.constant 0 : index
    %150 = vector.load %arg2[%c2_118, %c1_119, %c0_120, %c0_121] : memref<3x2x8x2xf32, #tpu.memory_space<vmem>>, vector<1x1x8x2xf32>
    %151 = vector.shape_cast %150 : vector<1x1x8x2xf32> to vector<8x2xf32>
    %c2_122 = arith.constant 2 : index
    %c1_123 = arith.constant 1 : index
    %c0_124 = arith.constant 0 : index
    %c0_125 = arith.constant 0 : index
    %152 = vector.load %arg3[%c2_122, %c1_123, %c0_124, %c0_125] : memref<3x2x8x2xf32, #tpu.memory_space<vmem>>, vector<1x1x8x2xf32>
    %153 = vector.shape_cast %152 : vector<1x1x8x2xf32> to vector<8x2xf32>
    %cst_126 = arith.constant dense<0.000000e+00> : vector<8x8xf32>
    %154 = tpu.matmul %149, %151, %cst_126 {dimension_numbers = #tpu.dot_dimension_numbers<[1], [1], [0], [0], [0, 0, 1, 0], [], []>} : vector<8x2xf32>, vector<8x2xf32>, vector<8x8xf32> -> vector<8x8xf32>
    %cst_127 = arith.constant 5.000000e-01 : f32
    %155 = vector.broadcast %cst_127 : f32 to vector<8x8xf32>
    %156 = arith.mulf %154, %155 : vector<8x8xf32>
    %cst_128 = arith.constant dense<0xFF800000> : vector<8xf32>
    %157 = vector.multi_reduction <maximumf>, %156, %cst_128 [1] : vector<8x8xf32> to vector<8xf32>
    %158 = vector.shape_cast %157 : vector<8xf32> to vector<8x1xf32>
    %159 = vector.broadcast %158 : vector<8x1xf32> to vector<8x8xf32>
    %160 = arith.subf %156, %159 : vector<8x8xf32>
    %161 = math.exp %160 : vector<8x8xf32>
    %cst_129 = arith.constant dense<0.000000e+00> : vector<8xf32>
    %162 = vector.multi_reduction <add>, %161, %cst_129 [1] : vector<8x8xf32> to vector<8xf32>
    %163 = vector.shape_cast %162 : vector<8xf32> to vector<8x1xf32>
    %164 = tpu.reciprocal %163 {approx = true} : vector<8x1xf32> -> vector<8x1xf32>
    %165 = arith.mulf %163, %164 : vector<8x1xf32>
    %cst_130 = arith.constant 2.000000e+00 : f32
    %166 = vector.broadcast %cst_130 : f32 to vector<8x1xf32>
    %167 = arith.subf %166, %165 : vector<8x1xf32>
    %168 = arith.mulf %164, %167 : vector<8x1xf32>
    %169 = vector.broadcast %168 : vector<8x1xf32> to vector<8x8xf32>
    %170 = arith.mulf %161, %169 : vector<8x8xf32>
    %cst_131 = arith.constant dense<0.000000e+00> : vector<8x2xf32>
    %171 = tpu.matmul %170, %153, %cst_131 {dimension_numbers = #tpu.dot_dimension_numbers<[1], [0], [0], [1], [0, 0, 1, 1], [], []>} : vector<8x8xf32>, vector<8x2xf32>, vector<8x2xf32> -> vector<8x2xf32>
    %c1_132 = arith.constant 1 : index
    %c0_133 = arith.constant 0 : index
    %c0_134 = arith.constant 0 : index
    %172 = vector.load %arg4[%c1_132, %c0_133, %c0_134] : memref<2x2x4xf32, #tpu.memory_space<vmem>>, vector<1x2x4xf32>
    %173 = vector.shape_cast %172 : vector<1x2x4xf32> to vector<2x4xf32>
    %cst_135 = arith.constant dense<0.000000e+00> : vector<8x4xf32>
    %174 = tpu.matmul %171, %173, %cst_135 {dimension_numbers = #tpu.dot_dimension_numbers<[1], [0], [0], [1], [0, 0, 1, 1], [], []>} : vector<8x2xf32>, vector<2x4xf32>, vector<8x4xf32> -> vector<8x4xf32>
    %175 = arith.addf %147, %174 : vector<8x4xf32>
    %176 = vector.broadcast %0 : vector<1x4xf32> to vector<8x4xf32>
    %177 = arith.addf %175, %176 : vector<8x4xf32>
    %c2_136 = arith.constant 2 : index
    %c0_137 = arith.constant 0 : index
    %c0_138 = arith.constant 0 : index
    %178 = vector.load %arg6[%c2_136, %c0_137, %c0_138] : memref<3x8x4xf32, #tpu.memory_space<vmem>>, vector<1x8x4xf32>
    %179 = vector.shape_cast %178 : vector<1x8x4xf32> to vector<8x4xf32>
    %180 = vector.shape_cast %177 : vector<8x4xf32> to vector<1x8x4xf32>
    tpu.vector_store %arg6[%c2_136, %c0_137, %c0_138], %180 {strides = array<i32>} : memref<3x8x4xf32, #tpu.memory_space<vmem>>, vector<1x8x4xf32>,
    return
  }
  func.func @transform_0(%arg0: i32) -> (i32, i32, i32, i32) {
    %c0_i32 = arith.constant 0 : i32
    %c0_i32_0 = arith.constant 0 : i32
    %c0_i32_1 = arith.constant 0 : i32
    %c0_i32_2 = arith.constant 0 : i32
    %c0_i32_3 = arith.constant 0 : i32
    return %c0_i32, %c0_i32_0, %c0_i32_1, %c0_i32_2 : i32, i32, i32, i32
  }
  func.func @transform_1(%arg0: i32) -> (i32, i32, i32, i32) {
    %c0_i32 = arith.constant 0 : i32
    %c0_i32_0 = arith.constant 0 : i32
    %c0_i32_1 = arith.constant 0 : i32
    %c0_i32_2 = arith.constant 0 : i32
    %c0_i32_3 = arith.constant 0 : i32
    return %c0_i32, %c0_i32_0, %c0_i32_1, %c0_i32_2 : i32, i32, i32, i32
  }
  func.func @transform_2(%arg0: i32) -> (i32, i32, i32, i32) {
    %c0_i32 = arith.constant 0 : i32
    %c0_i32_0 = arith.constant 0 : i32
    %c0_i32_1 = arith.constant 0 : i32
    %c0_i32_2 = arith.constant 0 : i32
    %c0_i32_3 = arith.constant 0 : i32
    return %c0_i32, %c0_i32_0, %c0_i32_1, %c0_i32_2 : i32, i32, i32, i32
  }
  func.func @transform_3(%arg0: i32) -> (i32, i32, i32) {
    %c0_i32 = arith.constant 0 : i32
    %c0_i32_0 = arith.constant 0 : i32
    %c0_i32_1 = arith.constant 0 : i32
    %c0_i32_2 = arith.constant 0 : i32
    return %c0_i32, %c0_i32_0, %c0_i32_1 : i32, i32, i32
  }
  func.func @transform_4(%arg0: i32) -> (i32, i32) {
    %c0_i32 = arith.constant 0 : i32
    %c0_i32_0 = arith.constant 0 : i32
    %c0_i32_1 = arith.constant 0 : i32
    return %c0_i32, %c0_i32_0 : i32, i32
  }
  func.func @transform_5(%arg0: i32) -> (i32, i32, i32) {
    %c0_i32 = arith.constant 0 : i32
    %c0_i32_0 = arith.constant 0 : i32
    %c0_i32_1 = arith.constant 0 : i32
    %c0_i32_2 = arith.constant 0 : i32
    return %c0_i32, %c0_i32_0, %c0_i32_1 : i32, i32, i32
  }
}

</mosaic_0001>

<bundles_post_ra>
// kernel: self_attention_einsum.1
= control target key start
LH: loop header
LB: loop body
LE: loop exit
PB: predicated region body
PF: predicated region fallthrough
CT: control target
= control target key end

     0   :  { %vm24_vm0 = vcmask 15360   ;;  %v1726_v0 = vmov 0.0   ;;  %vm1727_vm1 = vmmov 0   ;;  %vm102_vm2 = vcmask 64512   ;;  %s1946_s1 = inlined_call_operand.vmem [shape: f32[3,2,8,2], index: 1, kind: input, shape index: {}]   ;;  %s1947_s0 = inlined_call_operand.vmem [shape: f32[3,2,8,2], index: 0, kind: input, shape index: {}]   ;;  %s1948_s2 = inlined_call_operand.vmem [shape: f32[3,2,8,2], index: 2, kind: input, shape index: {}]   ;;  %s1949_s3 = inlined_call_operand.vmem [shape: f32[2,2,4], index: 3, kind: input, shape index: {}]   ;;  %s1950_s4 = inlined_call_operand.vmem [shape: f32[1,4], index: 4, kind: input, shape index: {}]   ;;  %s1951_s5 = inlined_call_operand.vmem [shape: f32[3,8,4], index: 5, kind: output, shape index: {}]  }
   0x1   :  { %1610 = vmatprep.subr.mxu0 %v1726_v0  ;;  %v22_v1 = vld [vmem:[%s1946_s1] sm:$0xff]  ;;  %1612 = vmatprep.mubr.msk.f32.mxu0 %vm1727_vm1, %v1726_v0  ;;  %v1527_v19 = vld [vmem:[%s1946_s1 + $0x8] sm:$0xff]  ;;  %vm366_vm3 = vcmask 1041408   ;;  %v1539_v41 = vld [vmem:[%s1946_s1 + $0x10] sm:$0xff]  ;;  %vm523_vm4 = vcmask 31744  }
   0x2   :  { %1611 = vmatpush3.xpose.msk.msra.mxu0 %vm24_vm0, %v22_v1  ;;  %v21_v2 = vld [vmem:[%s1947_s0] sm:$0xff]  ;;  %1615 = vmatprep.subr.mxu1 %v1726_v0  ;;  %v1526_v20 = vld [vmem:[%s1947_s0 + $0x8] sm:$0xff]  ;;  %v1538_v44 = vld [vmem:[%s1947_s0 + $0x10] sm:$0xff] }
   0x3   :  { %1617 = vmatprep.mubr.msk.f32.mxu1 %vm1727_vm1, %v1726_v0  ;;  %1625 = vmatprep.subr.mxu0 %v1726_v0  ;;  %v23_v12 = vld [vmem:[%s1948_s2] sm:$0xff]  ;;  %v1528_v32 = vld [vmem:[%s1948_s2 + $0x8] sm:$0xff]  ;;  %v1545_v45 = vld [vmem:[%s1946_s1 + $0x18] sm:$0xff] }
   0x4   :  { %1616 = vmatpush3.msra.mxu1 %v23_v12  ;;  %v1532_v33 = vld [vmem:[%s1949_s3 + $0x2] sm:$0x3]  ;;  %v190_v40 = vld [vmem:[%s1949_s3] sm:$0x3]  ;;  %v1544_v48 = vld [vmem:[%s1947_s0 + $0x18] sm:$0xff] }
   0x5   :  { %1613 = vmatmul.mubr.msk.f32.vlgmr.msra.gmra.mrb[0].mxu0 %vm24_vm0, %v21_v2  ;;  %1620 = vmatprep.subr.mxu1 %v1726_v0  ;;  %v1845_v49 = vld [vmem:[%s1950_s4] ss:$0 sm:$0xff] }
   0x6   :  { %1627 = vmatprep.mubr.msk.f32.mxu0 %vm1727_vm1, %v1726_v0  ;;  %1626 = vmatpush3.msra.mxu0 %v1528_v32  ;;  %v1562_v32 = vld [vmem:[%s1947_s0 + $0x28] sm:$0xff] }
   0x7   :  { %1635 = vmatprep.subr.mxu0 %v1726_v0 }
  0xd8   :  { %v97_v3 = vpop.f32.mrb[0].mxu0 }
  0xd9   :  { %v101_v4 = vmul.f32 0.5, %v97_v3  ;;  %v1614_v5 = vpop.f32.mrb[1].mxu0 }
  0xdb   :  { %v103_v6 = vsel %vm102_vm2, %v101_v4, -inf }
  0xdc   :  { %104 = vmax.xlane.f32.xlu0 %v103_v6 }
 0x169   :  { %v105_v7 = vpop.xlane.xlu0 %104 }
 0x16a   :  { %v106_v8 = vsub.f32 %v101_v4, %v105_v7 }
 0x16c   :  { %v107_v9 = vmul.f32 1.442695, %v106_v8 }
 0x16e   :  { %1702 = vpow2.f32 %v107_v9  ;;  %v1540_v9 = vld [vmem:[%s1948_s2 + $0x10] sm:$0xff] }
 0x178   :  { %v1703_v10 = vpop.eup %1702 }
 0x179   :  { %v109_v11 = vsel %vm102_vm2, %v1703_v10, 0.0 }
 0x17a   :  { %110 = vadd.xlane.f32.xlu0 %v109_v11 }
 0x207   :  { %v111_v13 = vpop.xlane.xlu0 %110 }
 0x208   :  { %1704 = vrcp.f32 %v111_v13 }
 0x212   :  { %v1705_v14 = vpop.eup %1704 }
 0x213   :  { %v113_v15 = vmul.f32 %v1705_v14, %v111_v13 }
 0x215   :  { %v114_v16 = vsub.f32 2.0, %v113_v15 }
 0x217   :  { %v115_v17 = vmul.f32 %v1705_v14, %v114_v16 }
 0x219   :  { %v116_v18 = vmul.f32 %v1703_v10, %v115_v17  ;;  %v1550_v10 = vld [vmem:[%s1949_s3 + $0x2] sm:$0x3] }
 0x21b   :  { %1618 = vmatmul.mubr.msk.f32.vlgmr.msra.gmra.mrb[0].mxu1 %vm102_vm2, %v116_v18 }
 0x21c   :  { %1621 = vmatpush3.xpose.msk.msra.mxu1 %vm24_vm0, %v1527_v19  ;;  %1622 = vmatprep.mubr.msk.f32.mxu1 %vm1727_vm1, %v1726_v0 }
 0x21d   :  { %1630 = vmatprep.subr.mxu1 %v1726_v0 }
 0x21f   :  { %1623 = vmatmul.mubr.msk.f32.vlgmr.msra.gmra.mrb[2].mxu1 %vm24_vm0, %v1526_v20 }
 0x220   :  { %1632 = vmatprep.mubr.msk.f32.mxu1 %vm1727_vm1, %v1726_v0  ;;  %1631 = vmatpush3.msk.msra.mxu1 %vm366_vm3, %v1532_v33 }
 0x221   :  { %1640 = vmatprep.subr.mxu1 %v1726_v0 }
 0x2ee   :  { %v186_v21 = vpop.f32.mrb[0].mxu1 }
 0x2ef   :  { %v1619_v22 = vpop.f32.mrb[1].mxu1 }
 0x2f2   :  { %v269_v23 = vpop.f32.mrb[2].mxu1 }
 0x2f3   :  { %v273_v24 = vmul.f32 0.5, %v269_v23  ;;  %v1624_v25 = vpop.f32.mrb[3].mxu1 }
 0x2f5   :  { %v274_v26 = vsel %vm102_vm2, %v273_v24, -inf }
 0x2f6   :  { %275 = vmax.xlane.f32.xlu1 %v274_v26 }
 0x383   :  { %v276_v27 = vpop.xlane.xlu1 %275 }
 0x384   :  { %v277_v28 = vsub.f32 %v273_v24, %v276_v27  ;;  %v695_v24 = vld [vmem:[%s1949_s3] sm:$0x3] }
 0x385   :  { %v1557_v27 = vld [vmem:[%s1946_s1 + $0x20] sm:$0xff] }
 0x386   :  { %v278_v29 = vmul.f32 1.442695, %v277_v28 }
 0x388   :  { %1706 = vpow2.f32 %v278_v29 }
 0x392   :  { %v1707_v30 = vpop.eup %1706 }
 0x393   :  { %v280_v31 = vsel %vm102_vm2, %v1707_v30, 0.0 }
 0x394   :  { %281 = vadd.xlane.f32.xlu1 %v280_v31  ;;  %v1563_v31 = vld [vmem:[%s1946_s1 + $0x28] sm:$0xff] }
 0x421   :  { %v282_v34 = vpop.xlane.xlu1 %281 }
 0x422   :  { %1708 = vrcp.f32 %v282_v34 }
 0x42c   :  { %v1709_v35 = vpop.eup %1708 }
 0x42d   :  { %v284_v36 = vmul.f32 %v1709_v35, %v282_v34 }
 0x42f   :  { %v285_v37 = vsub.f32 2.0, %v284_v36 }
 0x431   :  { %v286_v38 = vmul.f32 %v1709_v35, %v285_v37 }
 0x433   :  { %v287_v39 = vmul.f32 %v1707_v30, %v286_v38  ;;  %v1556_v30 = vld [vmem:[%s1947_s0 + $0x20] sm:$0xff] }
 0x435   :  { %1628 = vmatmul.mubr.msk.f32.vlgmr.msra.gmra.mrb[2].mxu0 %vm102_vm2, %v287_v39 }
 0x436   :  { %1636 = vmatpush3.msk.msra.mxu0 %vm366_vm3, %v190_v40  ;;  %1637 = vmatprep.mubr.msk.f32.mxu0 %vm1727_vm1, %v1726_v0 }
 0x437   :  { %1645 = vmatprep.subr.mxu0 %v1726_v0 }
 0x439   :  { %1638 = vmatmul.mubr.msk.f32.vlgmr.msra.gmra.mrb[4].mxu0 %vm24_vm0, %v186_v21  ;;  %v1546_v21 = vld [vmem:[%s1948_s2 + $0x18] sm:$0xff] }
 0x43a   :  { %1647 = vmatprep.mubr.msk.f32.mxu0 %vm1727_vm1, %v1726_v0  ;;  %1646 = vmatpush3.msra.mxu0 %v1540_v9  ;;  %v1192_v9 = vld [vmem:[%s1949_s3] sm:$0x3] }
 0x43b   :  { %1655 = vmatprep.subr.mxu0 %v1726_v0 }
 0x508   :  { %v357_v42 = vpop.f32.mrb[2].mxu0 }
 0x509   :  { %v1629_v43 = vpop.f32.mrb[3].mxu0  ;;  %1633 = vmatmul.mubr.msk.f32.vlgmr.msra.gmra.mrb[4].mxu1 %vm24_vm0, %v357_v42 }
 0x50a   :  { %1641 = vmatpush3.xpose.msk.msra.mxu1 %vm24_vm0, %v1539_v41  ;;  %1642 = vmatprep.mubr.msk.f32.mxu1 %vm1727_vm1, %v1726_v0 }
 0x50b   :  { %1650 = vmatprep.subr.mxu1 %v1726_v0 }
 0x50c   :  { %v512_v46 = vpop.f32.mrb[4].mxu0 }
 0x50d   :  { %v1639_v47 = vpop.f32.mrb[5].mxu0  ;;  %1643 = vmatmul.mubr.msk.f32.vlgmr.msra.gmra.mrb[6].mxu1 %vm24_vm0, %v1538_v44 }
 0x50e   :  { %1651 = vmatpush3.xpose.msk.msra.mxu1 %vm24_vm0, %v1545_v45  ;;  %1652 = vmatprep.mubr.msk.f32.mxu1 %vm1727_vm1, %v1726_v0 }
 0x50f   :  { %1660 = vmatprep.subr.mxu1 %v1726_v0 }
 0x511   :  { %1653 = vmatmul.mubr.msk.f32.vlgmr.msra.gmra.mrb[8].mxu1 %vm24_vm0, %v1544_v48 }
 0x512   :  { %1662 = vmatprep.mubr.msk.f32.mxu1 %vm1727_vm1, %v1726_v0  ;;  %1661 = vmatpush3.msk.msra.mxu1 %vm366_vm3, %v1550_v10  ;;  %v1568_v10 = vld [vmem:[%s1949_s3 + $0x2] sm:$0x3] }
 0x513   :  { %1670 = vmatprep.subr.mxu1 %v1726_v0 }
 0x5dc   :  { %v436_v50 = vpop.f32.mrb[4].mxu1 }
 0x5dd   :  { %v513_v51 = vadd.f32 %v512_v46, %v436_v50  ;;  %v1634_v52 = vpop.f32.mrb[5].mxu1 }
 0x5df   :  { %v522_v53 = vadd.f32 %v1845_v49, %v513_v51 }
 0x5e0   :  { %v603_v54 = vpop.f32.mrb[6].mxu1 }
 0x5e1   :  { %524 = vst.msk [vmem:[%s1951_s5] sm:$0xff] %vm523_vm4, %v522_v53  ;;  %v607_v55 = vmul.f32 0.5, %v603_v54  ;;  %v1644_v56 = vpop.f32.mrb[7].mxu1 }
 0x5e3   :  { %v608_v57 = vsel %vm102_vm2, %v607_v55, -inf }
 0x5e4   :  { %609 = vmax.xlane.f32.xlu0 %v608_v57  ;;  %v774_v58 = vpop.f32.mrb[8].mxu1 }
 0x5e5   :  { %v778_v59 = vmul.f32 0.5, %v774_v58  ;;  %v1654_v60 = vpop.f32.mrb[9].mxu1  ;;  %v1558_v58 = vld [vmem:[%s1948_s2 + $0x20] sm:$0xff] }
 0x5e7   :  { %v779_v61 = vsel %vm102_vm2, %v778_v59, -inf }
 0x5e8   :  { %780 = vmax.xlane.f32.xlu1 %v779_v61 }
 0x671   :  { %v610_v62 = vpop.xlane.xlu0 %609 }
 0x672   :  { %v611_v63 = vsub.f32 %v607_v55, %v610_v62 }
 0x674   :  { %v612_v1 = vmul.f32 1.442695, %v611_v63 }
 0x675   :  { %v781_v2 = vpop.xlane.xlu1 %780 }
 0x676   :  { %1710 = vpow2.f32 %v612_v1  ;;  %v782_v3 = vsub.f32 %v778_v59, %v781_v2 }
 0x678   :  { %v783_v4 = vmul.f32 1.442695, %v782_v3 }
 0x67a   :  { %1712 = vpow2.f32 %v783_v4 }
 0x680   :  { %v1711_v5 = vpop.eup %1710 }
 0x681   :  { %v614_v6 = vsel %vm102_vm2, %v1711_v5, 0.0 }
 0x682   :  { %615 = vadd.xlane.f32.xlu0 %v614_v6  ;;  %v1564_v6 = vld [vmem:[%s1948_s2 + $0x28] sm:$0xff] }
 0x684   :  { %v1713_v7 = vpop.eup %1712 }
 0x685   :  { %v785_v8 = vsel %vm102_vm2, %v1713_v7, 0.0 }
 0x686   :  { %786 = vadd.xlane.f32.xlu1 %v785_v8 }
 0x70f   :  { %v616_v11 = vpop.xlane.xlu0 %615 }
 0x710   :  { %1714 = vrcp.f32 %v616_v11 }
 0x713   :  { %v787_v12 = vpop.xlane.xlu1 %786 }
 0x714   :  { %1716 = vrcp.f32 %v787_v12 }
 0x71a   :  { %v1715_v13 = vpop.eup %1714 }
 0x71b   :  { %v618_v14 = vmul.f32 %v1715_v13, %v616_v11 }
 0x71d   :  { %v619_v15 = vsub.f32 2.0, %v618_v14 }
 0x71e   :  { %v1717_v16 = vpop.eup %1716 }
 0x71f   :  { %v620_v17 = vmul.f32 %v1715_v13, %v619_v15  ;;  %v789_v18 = vmul.f32 %v1717_v16, %v787_v12 }
 0x721   :  { %v621_v19 = vmul.f32 %v1711_v5, %v620_v17  ;;  %v790_v20 = vsub.f32 2.0, %v789_v18 }
 0x723   :  { %v791_v22 = vmul.f32 %v1717_v16, %v790_v20  ;;  %1648 = vmatmul.mubr.msk.f32.vlgmr.msra.gmra.mrb[6].mxu0 %vm102_vm2, %v621_v19 }
 0x724   :  { %1656 = vmatpush3.msra.mxu0 %v1546_v21  ;;  %1657 = vmatprep.mubr.msk.f32.mxu0 %vm1727_vm1, %v1726_v0 }
 0x725   :  { %v792_v23 = vmul.f32 %v1713_v7, %v791_v22  ;;  %1665 = vmatprep.subr.mxu0 %v1726_v0 }
 0x727   :  { %1658 = vmatmul.mubr.msk.f32.vlgmr.msra.gmra.mrb[8].mxu0 %vm102_vm2, %v792_v23 }
 0x728   :  { %1667 = vmatprep.mubr.msk.f32.mxu0 %vm1727_vm1, %v1726_v0  ;;  %1666 = vmatpush3.msk.msra.mxu0 %vm366_vm3, %v695_v24 }
 0x729   :  { %1675 = vmatprep.subr.mxu0 %v1726_v0 }
 0x7f6   :  { %v691_v25 = vpop.f32.mrb[6].mxu0 }
 0x7f7   :  { %v1649_v26 = vpop.f32.mrb[7].mxu0  ;;  %1668 = vmatmul.mubr.msk.f32.vlgmr.msra.gmra.mrb[10].mxu0 %vm24_vm0, %v691_v25 }
 0x7f8   :  { %1677 = vmatprep.mubr.msk.f32.mxu0 %vm1727_vm1, %v1726_v0  ;;  %1676 = vmatpush3.msra.mxu0 %v1558_v58 }
 0x7f9   :  { %1685 = vmatprep.subr.mxu0 %v1726_v0 }
 0x7fa   :  { %v862_v28 = vpop.f32.mrb[8].mxu0 }
 0x7fb   :  { %v1659_v29 = vpop.f32.mrb[9].mxu0  ;;  %1663 = vmatmul.mubr.msk.f32.vlgmr.msra.gmra.mrb[10].mxu1 %vm24_vm0, %v862_v28 }
 0x7fc   :  { %1671 = vmatpush3.xpose.msk.msra.mxu1 %vm24_vm0, %v1557_v27  ;;  %1672 = vmatprep.mubr.msk.f32.mxu1 %vm1727_vm1, %v1726_v0 }
 0x7fd   :  { %1680 = vmatprep.subr.mxu1 %v1726_v0 }
 0x7ff   :  { %1673 = vmatmul.mubr.msk.f32.vlgmr.msra.gmra.mrb[12].mxu1 %vm24_vm0, %v1556_v30 }
 0x800   :  { %1681 = vmatpush3.xpose.msk.msra.mxu1 %vm24_vm0, %v1563_v31  ;;  %1682 = vmatprep.mubr.msk.f32.mxu1 %vm1727_vm1, %v1726_v0 }
 0x801   :  { %1690 = vmatprep.subr.mxu1 %v1726_v0 }
 0x803   :  { %1683 = vmatmul.mubr.msk.f32.vlgmr.msra.gmra.mrb[14].mxu1 %vm24_vm0, %v1562_v32 }
 0x804   :  { %1692 = vmatprep.mubr.msk.f32.mxu1 %vm1727_vm1, %v1726_v0  ;;  %1691 = vmatpush3.msk.msra.mxu1 %vm366_vm3, %v1568_v10 }
 0x8ca   :  { %v1015_v33 = vpop.f32.mrb[10].mxu0 }
 0x8cb   :  { %v1669_v34 = vpop.f32.mrb[11].mxu0 }
 0x8ce   :  { %v939_v35 = vpop.f32.mrb[10].mxu1 }
 0x8cf   :  { %v1016_v36 = vadd.f32 %v1015_v33, %v939_v35  ;;  %v1664_v37 = vpop.f32.mrb[11].mxu1 }
 0x8d1   :  { %v1019_v38 = vadd.f32 %v1845_v49, %v1016_v36 }
 0x8d2   :  { %v1100_v39 = vpop.f32.mrb[12].mxu1 }
 0x8d3   :  { %1555 = vst.msk [vmem:[%s1951_s5 + $0x8] sm:$0xff] %vm523_vm4, %v1019_v38  ;;  %v1104_v40 = vmul.f32 0.5, %v1100_v39  ;;  %v1674_v41 = vpop.f32.mrb[13].mxu1 }
 0x8d5   :  { %v1105_v42 = vsel %vm102_vm2, %v1104_v40, -inf }
 0x8d6   :  { %1106 = vmax.xlane.f32.xlu0 %v1105_v42  ;;  %v1271_v43 = vpop.f32.mrb[14].mxu1 }
 0x8d7   :  { %v1275_v44 = vmul.f32 0.5, %v1271_v43  ;;  %v1684_v45 = vpop.f32.mrb[15].mxu1 }
 0x8d9   :  { %v1276_v46 = vsel %vm102_vm2, %v1275_v44, -inf }
 0x8da   :  { %1277 = vmax.xlane.f32.xlu1 %v1276_v46 }
 0x963   :  { %v1107_v47 = vpop.xlane.xlu0 %1106 }
 0x964   :  { %v1108_v48 = vsub.f32 %v1104_v40, %v1107_v47 }
 0x966   :  { %v1109_v50 = vmul.f32 1.442695, %v1108_v48 }
 0x967   :  { %v1278_v51 = vpop.xlane.xlu1 %1277 }
 0x968   :  { %1718 = vpow2.f32 %v1109_v50  ;;  %v1279_v52 = vsub.f32 %v1275_v44, %v1278_v51 }
 0x96a   :  { %v1280_v53 = vmul.f32 1.442695, %v1279_v52 }
 0x96c   :  { %1720 = vpow2.f32 %v1280_v53 }
 0x972   :  { %v1719_v54 = vpop.eup %1718 }
 0x973   :  { %v1111_v55 = vsel %vm102_vm2, %v1719_v54, 0.0 }
 0x974   :  { %1112 = vadd.xlane.f32.xlu0 %v1111_v55 }
 0x976   :  { %v1721_v56 = vpop.eup %1720 }
 0x977   :  { %v1282_v57 = vsel %vm102_vm2, %v1721_v56, 0.0 }
 0x978   :  { %1283 = vadd.xlane.f32.xlu1 %v1282_v57 }
 0xa01   :  { %v1113_v59 = vpop.xlane.xlu0 %1112 }
 0xa02   :  { %1722 = vrcp.f32 %v1113_v59 }
 0xa05   :  { %v1284_v60 = vpop.xlane.xlu1 %1283 }
 0xa06   :  { %1724 = vrcp.f32 %v1284_v60 }
 0xa0c   :  { %v1723_v61 = vpop.eup %1722 }
 0xa0d   :  { %v1115_v62 = vmul.f32 %v1723_v61, %v1113_v59 }
 0xa0f   :  { %v1116_v63 = vsub.f32 2.0, %v1115_v62 }
 0xa10   :  { %v1725_v1 = vpop.eup %1724 }
 0xa11   :  { %v1117_v2 = vmul.f32 %v1723_v61, %v1116_v63  ;;  %v1286_v3 = vmul.f32 %v1725_v1, %v1284_v60 }
 0xa13   :  { %v1118_v4 = vmul.f32 %v1719_v54, %v1117_v2  ;;  %v1287_v5 = vsub.f32 2.0, %v1286_v3 }
 0xa15   :  { %v1288_v7 = vmul.f32 %v1725_v1, %v1287_v5  ;;  %1678 = vmatmul.mubr.msk.f32.vlgmr.msra.gmra.mrb[12].mxu0 %vm102_vm2, %v1118_v4 }
 0xa16   :  { %1686 = vmatpush3.msra.mxu0 %v1564_v6  ;;  %1687 = vmatprep.mubr.msk.f32.mxu0 %vm1727_vm1, %v1726_v0 }
 0xa17   :  { %v1289_v8 = vmul.f32 %v1721_v56, %v1288_v7  ;;  %1695 = vmatprep.subr.mxu0 %v1726_v0 }
 0xa19   :  { %1688 = vmatmul.mubr.msk.f32.vlgmr.msra.gmra.mrb[14].mxu0 %vm102_vm2, %v1289_v8 }
 0xa1a   :  { %1697 = vmatprep.mubr.msk.f32.mxu0 %vm1727_vm1, %v1726_v0  ;;  %1696 = vmatpush3.msk.msra.mxu0 %vm366_vm3, %v1192_v9 }
 0xae8   :  { %v1188_v11 = vpop.f32.mrb[12].mxu0 }
 0xae9   :  { %v1679_v12 = vpop.f32.mrb[13].mxu0  ;;  %1698 = vmatmul.mubr.msk.f32.vlgmr.msra.gmra.mrb[16].mxu0 %vm24_vm0, %v1188_v11 }
 0xaec   :  { %v1359_v13 = vpop.f32.mrb[14].mxu0 }
 0xaed   :  { %v1689_v14 = vpop.f32.mrb[15].mxu0  ;;  %1693 = vmatmul.mubr.msk.f32.vlgmr.msra.gmra.mrb[16].mxu1 %vm24_vm0, %v1359_v13 }
 0xbbc   :  { %v1512_v0 = vpop.f32.mrb[16].mxu0 }
 0xbbd   :  { %v1699_v15 = vpop.f32.mrb[17].mxu0 }
 0xbc0   :  { %v1436_v16 = vpop.f32.mrb[16].mxu1 }
 0xbc1   :  { %v1513_v17 = vadd.f32 %v1512_v0, %v1436_v16  ;;  %v1694_v18 = vpop.f32.mrb[17].mxu1 }
 0xbc3   :  { %v1516_v19 = vadd.f32 %v1845_v49, %v1513_v17 }
 0xbc5   :  { %1573 = vst.msk [vmem:[%s1951_s5 + $0x10] sm:$0xff] %vm523_vm4, %v1516_v19 }

</bundles_post_ra>
